<compile_context>
chip_gen: v6e
topology: v6e:2x2x1
jax: 0.10.0
libtpu: 0.0.40
codegen_flags: <defaults>
</compile_context>

<pallas_src>
import functools
import math

import jax
import jax.numpy as jnp
from jax.experimental import pallas as pl
from jax.experimental.pallas import tpu as pltpu

LN_EPS = 1e-5


def _round_up(x: int, m: int) -> int:
    return ((int(x) + m - 1) // m) * m


def _round_down_pos(x: int, m: int) -> int:
    return max(m, (int(x) // m) * m)


def _vmem_caps():
    """(tile-sizing budget, vmem_limit ceiling) in bytes, generation-aware."""
    phys = 64 * 2**20  # conservative default = v7x per-TensorCore VMEM
    try:
        info = pltpu.get_tpu_info()
        phys = int(getattr(info, "vmem_capacity_bytes", phys))
    except Exception:  # query unavailable -> keep conservative default
        pass
    budget = int(min(0.80 * phys, 96 * 2**20))
    hard = int(min(0.95 * phys, 120 * 2**20))
    return budget, hard


# ---------------------------------------------------------------------------
# Kernels
# ---------------------------------------------------------------------------
def _ln_rows_f32(x):
    """Two-pass (numerically safe) LayerNorm of a (rows, D) tile, f32 stats."""
    x = x.astype(jnp.float32)
    inv_d = jnp.float32(1.0 / x.shape[-1])
    mean = jnp.sum(x, axis=-1, keepdims=True) * inv_d
    d = x - mean
    var = jnp.sum(d * d, axis=-1, keepdims=True) * inv_d
    return d * jax.lax.rsqrt(var + LN_EPS)


def _vnns_resident_kernel(x_ref, w_ref, b_ref, o_ref):
    # x_ref: (tm, D_in) row tile; w_ref: (D_in, D_out_pad) resident fused W;
    # b_ref: (1, D_out_pad) fused bias (f32); o_ref: (tm, D_out_pad).
    xn = _ln_rows_f32(x_ref[...]).astype(w_ref.dtype)
    out = jnp.dot(xn, w_ref[...], preferred_element_type=jnp.float32)
    o_ref[...] = (out + b_ref[...]).astype(o_ref.dtype)


def _vnns_streamed_kernel(x_ref, w_ref, b_ref, o_ref, xn_ref):
    # x_ref: (tm, D_in); w_ref: (D_in, tn); b_ref: (1, tn); o_ref: (tm, tn);
    # xn_ref: (tm, D_in) VMEM scratch carrying normalized rows across j.
    @pl.when(pl.program_id(1) == 0)
    def _():
        xn_ref[...] = _ln_rows_f32(x_ref[...]).astype(xn_ref.dtype)

    out = jnp.dot(xn_ref[...], w_ref[...], preferred_element_type=jnp.float32)
    o_ref[...] = (out + b_ref[...]).astype(o_ref.dtype)


# ---------------------------------------------------------------------------
# Parameter preparation (run ONCE, hoisted out of the per-forward path)
# ---------------------------------------------------------------------------
def prepare_vnns_params(ln_gamma, ln_beta, lin_w, lin_b,
                        compute_dtype=jnp.bfloat16):
    """Fold LayerNorm(gamma, beta) into the Linear(W, b).

    lin_w: (D_out, D_in) torch-style.  Returns
      w_fused: (D_in, D_out_pad) in `compute_dtype` (gamma folded, transposed,
               zero-padded so the output last dim is lane dense),
      b_fused: (1, D_out_pad) float32,
      d_out:   original D_out (for slicing the padded output).

    Note: casting the fused weight to bf16 re-rounds it slightly relative to
    the unfused f32 PyTorch path; pass compute_dtype=jnp.float32 for exactness.
    TODO(synk): optionally quantize the fused weight to fp8 on v7x.
    """
    if not jnp.issubdtype(jnp.dtype(compute_dtype), jnp.floating):
        raise ValueError("compute_dtype must be a floating dtype for the MXU")
    d_out, d_in = lin_w.shape
    w_t = lin_w.T.astype(jnp.float32)                         # (D_in, D_out)
    w_fused = ln_gamma.astype(jnp.float32)[:, None] * w_t
    b_fused = ln_beta.astype(jnp.float32) @ w_t + lin_b.astype(jnp.float32)

    d_out_pad = _round_up(d_out, 128)
    if d_out_pad != d_out:
        w_fused = jnp.pad(w_fused, ((0, 0), (0, d_out_pad - d_out)))
        b_fused = jnp.pad(b_fused, (0, d_out_pad - d_out))
    return (w_fused.astype(compute_dtype),
            b_fused.reshape(1, d_out_pad).astype(jnp.float32),
            int(d_out))


# ---------------------------------------------------------------------------
# Forward
# ---------------------------------------------------------------------------
@functools.partial(
    jax.jit,
    static_argnames=("d_out", "tm", "tn", "out_dtype", "force_streamed"))
def vnns_apply(x, w_fused, b_fused, d_out, *, tm=None, tn=None,
               out_dtype=None, force_streamed=False):
    """x: (..., D_in) -> (..., d_out) using the prepared fused parameters."""
    *lead, d_in = x.shape
    d_out_pad = w_fused.shape[1]
    M = int(math.prod(lead)) if lead else 1
    out_dtype = jnp.dtype(x.dtype if out_dtype is None else out_dtype)

    x2d = x.reshape(M, d_in)
    isz = lambda dt: jnp.dtype(dt).itemsize
    x_isz, w_isz, o_isz = isz(x2d.dtype), isz(w_fused.dtype), isz(out_dtype)
    budget, hard_cap = _vmem_caps()
    w_bytes = d_in * d_out_pad * w_isz

    # MXU-operand / xn-scratch dtype: pinned to a floating dtype.
    xn_dtype = (w_fused.dtype
                if jnp.issubdtype(w_fused.dtype, jnp.floating)
                else jnp.bfloat16)
    xn_isz = isz(xn_dtype)

    # Largest legal row-tile cap without padding x (partial last tile is fine;
    # a block > array along sublanes is avoided except for tiny M).
    m_cap = M if (M <= 8 or M % 8 == 0) else _round_down_pos(M, 8)

    resident = (not force_streamed) and (w_bytes <= int(0.4 * budget))

    if resident:
        # ------------- resident-W path: W read from HBM exactly once --------
        tm_req = 512 if tm is None else max(8, (int(tm) // 8) * 8)
        denom = 2 * (d_in * x_isz + d_out_pad * o_isz)       # x + out, 2 bufs
        avail = budget - 2 * w_bytes - 2 * d_out_pad * 4
        tm_fit = _round_down_pos(max(avail, 8 * denom) // denom, 8)
        tm_eff = min(tm_req, tm_fit, m_cap)
        if M >= 512 and pl.cdiv(M, tm_eff) < 2:              # feed both v7x TCs
            tm_eff = _round_up(pl.cdiv(M, 2), 8)
        nm = int(pl.cdiv(M, tm_eff))

        est = (2 * w_bytes + 2 * d_out_pad * 4
               + tm_eff * denom)
        cost = pl.CostEstimate(
            flops=int(2 * M * d_in * d_out_pad + 6 * M * d_in),
            transcendentals=int(M),
            bytes_accessed=int(M * d_in * x_isz + w_bytes + d_out_pad * 4
                               + M * d_out_pad * o_isz),
        )
        out2d = pl.pallas_call(
            _vnns_resident_kernel,
            out_shape=jax.ShapeDtypeStruct((M, d_out_pad), out_dtype),
            grid_spec=pltpu.PrefetchScalarGridSpec(
                num_scalar_prefetch=0,
                grid=(nm,),
                in_specs=[
                    pl.BlockSpec((tm_eff, d_in), lambda i: (i, 0)),        # x
                    pl.BlockSpec((d_in, d_out_pad), lambda i: (0, 0)),     # W
                    pl.BlockSpec((1, d_out_pad), lambda i: (0, 0)),        # b
                ],
                out_specs=pl.BlockSpec((tm_eff, d_out_pad), lambda i: (i, 0)),
            ),
            compiler_params=pltpu.CompilerParams(
                dimension_semantics=("parallel",),
                vmem_limit_bytes=int(min(hard_cap,
                                         max(est + 8 * 2**20, 32 * 2**20))),
            ),
            cost_estimate=cost,
        )(x2d, w_fused, b_fused)
    else:
        # ------------- streamed-W path: big row tile meets the W roofline ----
        if tn is not None:
            tn_user = max(128, (int(tn) // 128) * 128)
            tn_eff = tn_user if d_out_pad % tn_user == 0 else (
                256 if d_out_pad % 256 == 0 else 128)
        else:
            tn_eff = 256 if d_out_pad % 256 == 0 else 128
        tm_req = 1024 if tm is None else max(8, (int(tm) // 8) * 8)

        # VMEM: 2x x tile + 1 xn scratch + 2x W tile + 2x out tile + bias.
        # TODO(synk): K-tile the weight (k grid axis + f32 accumulator) for
        # very large D_in where even one (tm, D_in) row tile overflows VMEM.
        fixed = 2 * d_in * tn_eff * w_isz + 2 * tn_eff * 4
        per_row = d_in * (2 * x_isz + xn_isz) + 2 * tn_eff * o_isz
        tm_fit = _round_down_pos(max(budget - fixed, 8 * per_row) // per_row, 8)
        tm_eff = min(tm_req, tm_fit, m_cap)
        if M >= 512 and pl.cdiv(M, tm_eff) < 2:
            tm_eff = _round_up(pl.cdiv(M, 2), 8)
        nm = int(pl.cdiv(M, tm_eff))
        nn = d_out_pad // tn_eff

        est = fixed + tm_eff * per_row
        cost = pl.CostEstimate(
            flops=int(2 * M * d_in * d_out_pad + 6 * M * d_in),
            transcendentals=int(M),
            bytes_accessed=int(M * d_in * x_isz
                               + nm * d_in * d_out_pad * w_isz  # W re-streamed
                               + nm * d_out_pad * 4
                               + M * d_out_pad * o_isz),
        )
        out2d = pl.pallas_call(
            _vnns_streamed_kernel,
            out_shape=jax.ShapeDtypeStruct((M, d_out_pad), out_dtype),
            grid_spec=pltpu.PrefetchScalarGridSpec(
                num_scalar_prefetch=0,
                grid=(nm, nn),
                in_specs=[
                    pl.BlockSpec((tm_eff, d_in), lambda i, j: (i, 0)),     # x
                    pl.BlockSpec((d_in, tn_eff), lambda i, j: (0, j)),     # W
                    pl.BlockSpec((1, tn_eff), lambda i, j: (0, j)),        # b
                ],
                out_specs=pl.BlockSpec((tm_eff, tn_eff), lambda i, j: (i, j)),
                scratch_shapes=[pltpu.VMEM((tm_eff, d_in), xn_dtype)],
            ),
            compiler_params=pltpu.CompilerParams(
                # j carries the xn scratch -> "arbitrary"; i is independent.
                dimension_semantics=("parallel", "arbitrary"),
                vmem_limit_bytes=int(min(hard_cap,
                                         max(est + 8 * 2**20, 32 * 2**20))),
            ),
            cost_estimate=cost,
        )(x2d, w_fused, b_fused)

    return out2d[:, :d_out].reshape(*lead, d_out)


def vector_norm_n_scale(x, ln_gamma, ln_beta, lin_w, lin_b,
                        *, compute_dtype=jnp.bfloat16, **kwargs):
    """Convenience one-shot wrapper (prefer hoisting prepare_vnns_params)."""
    w_fused, b_fused, d_out = prepare_vnns_params(
        ln_gamma, ln_beta, lin_w, lin_b, compute_dtype=compute_dtype)
    return vnns_apply(x, w_fused, b_fused, d_out=d_out, **kwargs)


# ---------------------------------------------------------------------------
# Reference + self-test
# ---------------------------------------------------------------------------
def _reference(x, ln_gamma, ln_beta, lin_w, lin_b):
    x = x.astype(jnp.float32)
    mean = jnp.mean(x, axis=-1, keepdims=True)
    var = jnp.mean((x - mean) ** 2, axis=-1, keepdims=True)
    xn = (x - mean) / jnp.sqrt(var + LN_EPS)
    xn = xn * ln_gamma + ln_beta
    return xn @ lin_w.T.astype(jnp.float32) + lin_b


if __name__ == "__main__":
    key = jax.random.PRNGKey(0)

    def make_params(k, d_in, d_out):
        kw, kb, kg, kbe = jax.random.split(k, 4)
        gamma = 1.0 + 0.1 * jax.random.normal(kg, (d_in,), dtype=jnp.float32)
        beta = 0.1 * jax.random.normal(kbe, (d_in,), dtype=jnp.float32)
        bound = 1.0 / float(d_in) ** 0.5
        w = jax.random.uniform(kw, (d_out, d_in), minval=-bound, maxval=bound,
                               dtype=jnp.float32)
        b = jax.random.uniform(kb, (d_out,), minval=-bound, maxval=bound,
                               dtype=jnp.float32)
        return gamma, beta, w, b

    # 1) Small module-consistent shapes, exact f32 compute, resident-W path.
    B, S, D_in, D_out = 2, 8, 32, 64
    k1, k2, key = jax.random.split(key, 3)
    x = jax.random.normal(k1, (B, S, D_in), dtype=jnp.float32)
    gamma, beta, w, b = make_params(k2, D_in, D_out)
    w_f32, b_f32, do = prepare_vnns_params(gamma, beta, w, b,
                                           compute_dtype=jnp.float32)
    out = jax.block_until_ready(vnns_apply(x, w_f32, b_f32, d_out=do))
    ref = _reference(x, gamma, beta, w, b)
    assert out.shape == (B, S, D_out)
    assert jnp.allclose(out, ref, atol=1e-4, rtol=1e-4), "f32 resident mismatch"

    # 2) bf16 MXU compute, resident-W path (default configuration).
    B2, S2, D_in2, D_out2 = 3, 100, 256, 384
    k1, k2, key = jax.random.split(key, 3)
    x2 = jax.random.normal(k1, (B2, S2, D_in2), dtype=jnp.float32)
    g2, be2, w2, b2 = make_params(k2, D_in2, D_out2)
    w_bf, b_bf, do2 = prepare_vnns_params(g2, be2, w2, b2)  # bf16 default
    out2 = jax.block_until_ready(vnns_apply(x2, w_bf, b_bf, d_out=do2))
    ref2 = _reference(x2, g2, be2, w2, b2)
    assert out2.shape == (B2, S2, D_out2)
    assert jnp.allclose(out2, ref2, atol=5e-2, rtol=5e-2), "bf16 resident mismatch"

    # 3) Force the streamed-W path (exercises the 2-D grid, xn scratch, and a
    #    partial last row tile without any wrapper-side padding of x).
    out3 = jax.block_until_ready(
        vnns_apply(x2, w_bf, b_bf, d_out=do2, force_streamed=True))
    assert out3.shape == (B2, S2, D_out2)
    assert jnp.allclose(out3, ref2, atol=5e-2, rtol=5e-2), "bf16 streamed mismatch"

    print("KERNEL_OK")
</pallas_src>

<mosaic_0001>
module attributes {stable_mosaic.version = 11 : i64} {
  func.func @_vnns_resident_kernel(%arg0: i32, %arg1: memref<16x32xf32, #tpu.memory_space<vmem>>, %arg2: memref<32x128xf32, #tpu.memory_space<vmem>>, %arg3: memref<1x128xf32, #tpu.memory_space<vmem>>, %arg4: memref<16x128xf32, #tpu.memory_space<vmem>>) attributes {dimension_semantics = [#tpu.dimension_semantics<parallel>], iteration_bounds = array<i64: 1>, scalar_prefetch = 0 : i64, scratch_operands = 0 : i64, tpu.core_type = #tpu.core_type<tc>, window_params = [{transform_indices = @transform_0, window_bounds = array<i64: 16, 32>}, {pipeline_mode = #tpu.pipeline_mode<synchronous>, transform_indices = @transform_1, window_bounds = array<i64: 32, 128>}, {pipeline_mode = #tpu.pipeline_mode<synchronous>, transform_indices = @transform_2, window_bounds = array<i64: 1, 128>}, {transform_indices = @transform_3, window_bounds = array<i64: 16, 128>}]} {
    %c0 = arith.constant 0 : index
    %c0_0 = arith.constant 0 : index
    %0 = vector.load %arg1[%c0, %c0_0] : memref<16x32xf32, #tpu.memory_space<vmem>>, vector<16x32xf32>
    %cst = arith.constant dense<0.000000e+00> : vector<16xf32>
    %1 = vector.multi_reduction <add>, %0, %cst [1] : vector<16x32xf32> to vector<16xf32>
    %2 = vector.shape_cast %1 : vector<16xf32> to vector<16x1xf32>
    %cst_1 = arith.constant 3.125000e-02 : f32
    %3 = vector.broadcast %cst_1 : f32 to vector<16x1xf32>
    %4 = arith.mulf %2, %3 : vector<16x1xf32>
    %5 = vector.broadcast %4 : vector<16x1xf32> to vector<16x32xf32>
    %6 = arith.subf %0, %5 : vector<16x32xf32>
    %7 = arith.mulf %6, %6 : vector<16x32xf32>
    %cst_2 = arith.constant dense<0.000000e+00> : vector<16xf32>
    %8 = vector.multi_reduction <add>, %7, %cst_2 [1] : vector<16x32xf32> to vector<16xf32>
    %9 = vector.shape_cast %8 : vector<16xf32> to vector<16x1xf32>
    %cst_3 = arith.constant 3.125000e-02 : f32
    %10 = vector.broadcast %cst_3 : f32 to vector<16x1xf32>
    %11 = arith.mulf %9, %10 : vector<16x1xf32>
    %cst_4 = arith.constant 9.99999974E-6 : f32
    %12 = vector.broadcast %cst_4 : f32 to vector<16x1xf32>
    %13 = arith.addf %11, %12 : vector<16x1xf32>
    %14 = math.rsqrt %13 : vector<16x1xf32>
    %15 = vector.broadcast %14 : vector<16x1xf32> to vector<16x32xf32>
    %16 = arith.mulf %6, %15 : vector<16x32xf32>
    %c0_5 = arith.constant 0 : index
    %c0_6 = arith.constant 0 : index
    %17 = vector.load %arg2[%c0_5, %c0_6] : memref<32x128xf32, #tpu.memory_space<vmem>>, vector<32x128xf32>
    %cst_7 = arith.constant dense<0.000000e+00> : vector<16x128xf32>
    %18 = tpu.matmul %16, %17, %cst_7 {dimension_numbers = #tpu.dot_dimension_numbers<[1], [0], [0], [1], [0, 0, 1, 1], [], []>} : vector<16x32xf32>, vector<32x128xf32>, vector<16x128xf32> -> vector<16x128xf32>
    %c0_8 = arith.constant 0 : index
    %c0_9 = arith.constant 0 : index
    %19 = vector.load %arg3[%c0_8, %c0_9] : memref<1x128xf32, #tpu.memory_space<vmem>>, vector<1x128xf32>
    %20 = vector.broadcast %19 : vector<1x128xf32> to vector<16x128xf32>
    %21 = arith.addf %18, %20 : vector<16x128xf32>
    %c0_10 = arith.constant 0 : index
    %c0_11 = arith.constant 0 : index
    %22 = vector.load %arg4[%c0_10, %c0_11] : memref<16x128xf32, #tpu.memory_space<vmem>>, vector<16x128xf32>
    tpu.vector_store %arg4[%c0_10, %c0_11], %21 {strides = array<i32>} : memref<16x128xf32, #tpu.memory_space<vmem>>, vector<16x128xf32>,
    return
  }
  func.func @transform_0(%arg0: i32) -> (i32, i32) {
    %c0_i32 = arith.constant 0 : i32
    %c0_i32_0 = arith.constant 0 : i32
    return %arg0, %c0_i32 : i32, i32
  }
  func.func @transform_1(%arg0: i32) -> (i32, i32) {
    %c0_i32 = arith.constant 0 : i32
    %c0_i32_0 = arith.constant 0 : i32
    %c0_i32_1 = arith.constant 0 : i32
    return %c0_i32, %c0_i32_0 : i32, i32
  }
  func.func @transform_2(%arg0: i32) -> (i32, i32) {
    %c0_i32 = arith.constant 0 : i32
    %c0_i32_0 = arith.constant 0 : i32
    %c0_i32_1 = arith.constant 0 : i32
    return %c0_i32, %c0_i32_0 : i32, i32
  }
  func.func @transform_3(%arg0: i32) -> (i32, i32) {
    %c0_i32 = arith.constant 0 : i32
    %c0_i32_0 = arith.constant 0 : i32
    return %arg0, %c0_i32 : i32, i32
  }
}

</mosaic_0001>

<bundles_post_ra>
// kernel: vnns_apply.1
= control target key start
LH: loop header
LB: loop body
LE: loop exit
PB: predicated region body
PF: predicated region fallthrough
CT: control target
= control target key end

     0   :  { %8 = vsyncpa [#allocation3], 0  ;;  %s288_s0 = inlined_call_operand.hbm [shape: f32[16,32], index: 0, kind: input, shape index: {}]   ;;  %s289_s1 = inlined_call_operand.hbm [shape: f32[32,128], index: 1, kind: input, shape index: {}]   ;;  %s290_s2 = inlined_call_operand.vmem [shape: f32[1,128], index: 2, kind: input, shape index: {}]   ;;  %s291_s3 = inlined_call_operand.vmem [shape: f32[16,128], index: 3, kind: output, shape index: {}]  }
   0x1   :  { %9 = vsyncpa [#allocation5], 0  ;;  %s243_s12 = smov [#allocation2]  }
   0x2   :  { %s15_s13 = sshll.u32 %s243_s12, 4  ;;  %s16_s13 = int_to_ptr.vmem [resolvable:$true] %s15_s13 }
   0x3   :  { %s207_s14 = scalar_lea.vmem %s16_s13, 256  ;;  %p212_p1 = scmp.lt.s32.totalorder %s16_s13, %s16_s13 }
   0x4   :  { %p208_p0 = scmp.ne.s32.totalorder %s16_s13, %s207_s14  ;;  %p213_p2 = scmp.lt.s32.totalorder %s207_s14, %s207_s14 }
   0x6   :  { %p214_p3 = por %p213_p2, %p212_p1 }
   0x8   :  { %p215_p4 = pnand %p214_p3, %p208_p0 }
   0xa   :  { %218 = shalt.err (!%p215_p4)
}
   0xb   :  { %s244_s15 = smov 128   ;;  %s245_s16 = smov 8  }
   0xc   :  { %21 = dma.hbm_to_vmem [thread:$0]  %s288_s0, 256, %s16_s13, [#allocation3], %s244_s15, %s244_s15, %s245_s16  }
   0xd   :  { %s246_s19 = smov [#allocation4]  }
   0xe   :  { %s27_s20 = sshll.u32 %s246_s19, 4  ;;  %s28_s20 = int_to_ptr.vmem [resolvable:$true] %s27_s20 }
   0xf   :  { %s227_s21 = scalar_lea.vmem %s28_s20, 512  ;;  %p232_p6 = scmp.lt.s32.totalorder %s28_s20, %s28_s20 }
  0x10   :  { %p228_p5 = scmp.ne.s32.totalorder %s28_s20, %s227_s21  ;;  %p233_p7 = scmp.lt.s32.totalorder %s227_s21, %s227_s21 }
  0x12   :  { %p234_p8 = por %p233_p7, %p232_p6 }
  0x14   :  { %p235_p9 = pnand %p234_p8, %p228_p5 }
  0x16   :  { %238 = shalt.err (!%p235_p9)
}
  0x17   :  { %33 = dma.hbm_to_vmem [thread:$0]  %s289_s1, 512, %s28_s20, [#allocation5], %s244_s15, %s244_s15, %s245_s16  }
  0x18   :  { %239 = dma.done.wait [#allocation3], 256  }
  0x19   :  { %240 = vsyncadd [#allocation3], 4294967040 }
  0x1a   :  { %241 = dma.done.wait [#allocation5], 512  }
  0x1b   :  { %242 = vsyncadd [#allocation5], 4294966784  ;;  %vm44_vm0 = vcmask 261120   ;;  %v42_v0 = vld [vmem:[#allocation2] sm:$0xff]  ;;  %v43_v1 = vld [vmem:[#allocation2 + $0x8] sm:$0xff] }
  0x1c   :  { %v45_v2 = vsel %vm44_vm0, %v42_v0, 0.0  ;;  %v48_v3 = vsel %vm44_vm0, %v43_v1, 0.0  ;;  %v74_v14 = vld [vmem:[#allocation4 + $0x18] sm:$0xff]  ;;  %v73_v15 = vld [vmem:[#allocation4 + $0x10] sm:$0xff]  ;;  %v72_v16 = vld [vmem:[#allocation4 + $0x8] sm:$0xff] }
  0x1d   :  { %46 = vadd.xlane.f32.xlu0 %v45_v2  ;;  %180 = vmatprep.subr.mxu0 %v74_v14  ;;  %v71_v17 = vld [vmem:[#allocation4] sm:$0xff]  ;;  %v171_v28 = vld [vmem:[%s290_s2] ss:$0 sm:$0xff] }
  0x1e   :  { %181 = vmatpush3.msra.mxu0 %v74_v14 }
  0x1f   :  { %182 = vmatprep.subr.mxu0 %v73_v15 }
  0x20   :  { %183 = vmatpush3.msra.mxu0 %v73_v15 }
  0x21   :  { %49 = vadd.xlane.f32.xlu0 %v48_v3  ;;  %184 = vmatprep.subr.mxu0 %v72_v16 }
  0x22   :  { %185 = vmatpush3.msra.mxu0 %v72_v16 }
  0x23   :  { %186 = vmatprep.subr.mxu0 %v71_v17 }
  0x24   :  { %187 = vmatpush3.msra.mxu0 %v71_v17 }
  0xa6   :  { %v47_v4 = vpop.xlane.xlu0 %46 }
  0xa7   :  { %v51_v5 = vmul.f32 0.03125, %v47_v4 }
  0xa9   :  { %v53_v6 = vsub.f32 %v42_v0, %v51_v5 }
  0xaa   :  { %v50_v7 = vpop.xlane.xlu0 %49 }
  0xab   :  { %v52_v8 = vmul.f32 0.03125, %v50_v7  ;;  %v55_v9 = vmul.f32 %v53_v6, %v53_v6 }
  0xad   :  { %v54_v10 = vsub.f32 %v43_v1, %v52_v8  ;;  %v57_v11 = vsel %vm44_vm0, %v55_v9, 0.0 }
  0xae   :  { %58 = vadd.xlane.f32.xlu1 %v57_v11 }
  0xaf   :  { %v56_v12 = vmul.f32 %v54_v10, %v54_v10 }
  0xb1   :  { %v60_v13 = vsel %vm44_vm0, %v56_v12, 0.0 }
  0xb2   :  { %61 = vadd.xlane.f32.xlu1 %v60_v13 }
 0x137   :  { %v59_v18 = vpop.xlane.xlu1 %58 }
 0x138   :  { %v63_v19 = vmul.f32 0.03125, %v59_v18 }
 0x13a   :  { %v65_v20 = vadd.f32 1e-05, %v63_v19 }
 0x13b   :  { %v62_v21 = vpop.xlane.xlu1 %61 }
 0x13c   :  { %195 = vrsqrt.f32 %v65_v20  ;;  %v64_v22 = vmul.f32 0.03125, %v62_v21 }
 0x13e   :  { %v66_v23 = vadd.f32 1e-05, %v64_v22 }
 0x140   :  { %197 = vrsqrt.f32 %v66_v23 }
 0x149   :  { %v196_v24 = vpop.eup %195 }
 0x14a   :  { %v69_v25 = vmul.f32 %v196_v24, %v53_v6 }
 0x14c   :  { %188 = vmatprep.mubr.msk.f32.mxu0 %vm44_vm0, %v69_v25 }
 0x14d   :  { %v198_v26 = vpop.eup %197 }
 0x14e   :  { %v70_v27 = vmul.f32 %v198_v26, %v54_v10 }
 0x150   :  { %189 = vmatmul.mubr.msk.f32.vlgmr.msra.gmra.mxu0 %vm44_vm0, %v70_v27 }
 0x210   :  { %v190_v29 = vpop.f32.mrf.mxu0 }
 0x211   :  { %v160_v30 = vadd.f32 %v190_v29, %v171_v28 }
 0x212   :  { %v154_v31 = vpop.f32.mrf.mxu0 }
 0x213   :  { %164 = vst [vmem:[%s291_s3 + $0x8] sm:$0xff] %v160_v30  ;;  %v155_v32 = vadd.f32 %v171_v28, %v154_v31 }
 0x215   :  { %163 = vst [vmem:[%s291_s3] sm:$0xff] %v155_v32 }
 0x216   :  { %169 = vsyncpa [#allocation3], 1 }
 0x217   :  { %170 = vsyncpa [#allocation5], 1 }

</bundles_post_ra>
